<compile_context>
chip_gen: v6e
topology: v6e:2x2x1
jax: 0.10.0
libtpu: 0.0.40
codegen_flags: <defaults>
</compile_context>

<pallas_src>
import functools

import jax
import jax.numpy as jnp
from jax.experimental import pallas as pl
from jax.experimental.pallas import tpu as pltpu

GAMMA = 2.0


def _focal_loss_kernel(logits_ref, targets_ref, out_ref, acc_ref, *,
                       total_n, tile_n, steps_per_core, gamma):
    c = pl.program_id(0)      # core-split index ("parallel")
    i = pl.program_id(1)      # reduction step within this core ("arbitrary")

    @pl.when(i == 0)
    def _():
        acc_ref[...] = jnp.zeros_like(acc_ref)

    logits = logits_ref[...].astype(jnp.float32)            # (TN, C)
    tgt = targets_ref[...]                                   # (TN, 1) int32

    # Numerically-stable log-sum-exp along the class (lane) axis.
    m = jnp.max(logits, axis=-1, keepdims=True)
    shifted = logits - m
    lse = jnp.log(jnp.sum(jnp.exp(shifted), axis=-1, keepdims=True))

    # Gather the shifted logit of the target class via one-hot masking.
    # A (1, C) lane-only iota is broadcast against the (TN, 1) targets, so no
    # full (TN, C) iota is generated and no (TN, C) log-prob tile exists.
    col = jax.lax.broadcasted_iota(jnp.int32, (1, logits.shape[-1]), 1)
    shifted_t = jnp.sum(jnp.where(col == tgt, shifted, 0.0), axis=-1,
                        keepdims=True)                       # (TN, 1)

    logp_t = shifted_t - lse                                 # log p_target
    ce = -logp_t                                             # per-sample CE
    pt = jnp.exp(logp_t)
    one_m_pt = 1.0 - pt
    if gamma == 2.0:
        focal = one_m_pt * one_m_pt * ce                     # exact VPU square
    else:
        focal = jnp.power(jnp.maximum(one_m_pt, 0.0), gamma) * ce

    # Mask rows that are padding (N rounded up to fill the grid).
    row0 = (c * steps_per_core + i) * tile_n
    row = jax.lax.broadcasted_iota(jnp.int32, focal.shape, 0) + row0
    focal = jnp.where(row < total_n, focal, 0.0)

    # One small cross-sublane reduce per step into a (1, 1) scalar accumulator
    # (replaces the lane-sparse (tile_n, 1) accumulator).
    acc_ref[...] += jnp.sum(focal, axis=0, keepdims=True)

    @pl.when(i == pl.num_programs(1) - 1)
    def _():
        r = jax.lax.broadcasted_iota(jnp.int32, out_ref.shape, 0)
        l = jax.lax.broadcasted_iota(jnp.int32, out_ref.shape, 1)
        out_ref[...] = jnp.where((r == 0) & (l == 0), acc_ref[...], 0.0)


def _cdiv(a, b):
    return -(-a // b)


def focal_loss(logits, targets, *, gamma=GAMMA, tile_n=None, n_split=2):
    """logits: (N, C) float, targets: (N,) int. Returns scalar mean focal loss."""
    N, C = logits.shape
    itemsize = jnp.dtype(logits.dtype).itemsize
    row_align = 8 if itemsize >= 4 else 16                   # sublane packing

    # --- Generation-aware VMEM budget --------------------------------------
    try:
        vmem_cap = int(pltpu.get_tpu_info().vmem_capacity_bytes)
    except Exception:
        vmem_cap = 64 * 2**20                                # conservative (v7x/TC)
    headroom = 16 * 2**20                                    # compiler scratch etc.
    usable = max(16 * 2**20, vmem_cap - headroom)

    # Double-buffered per-row cost: logits row + lane-padded int32 target row.
    per_row_db = 2 * (C * itemsize + 128 * 4)
    reserve = 2 * 2**20                                      # out block, acc, misc
    max_rows = max(row_align, (usable - reserve) // per_row_db)
    max_rows = max(row_align, (max_rows // row_align) * row_align)

    needed_rows = _cdiv(N, row_align) * row_align
    if tile_n is None:
        tile_n = int(min(max_rows, needed_rows))
    else:
        # Validate/clamp caller-supplied tile_n against the VMEM budget.
        tile_n = int(min(tile_n, max_rows))
    tile_n = max(row_align, (tile_n // row_align) * row_align)

    steps = _cdiv(N, tile_n)
    steps_per_core = _cdiv(steps, n_split)
    n_pad = steps_per_core * n_split * tile_n

    logits_p = logits
    targets2d = targets.astype(jnp.int32).reshape(N, 1)
    if n_pad != N:
        logits_p = jnp.pad(logits, ((0, n_pad - N), (0, 0)))
        targets2d = jnp.pad(targets2d, ((0, n_pad - N), (0, 0)))

    kernel = functools.partial(
        _focal_loss_kernel,
        total_n=N, tile_n=tile_n, steps_per_core=steps_per_core, gamma=gamma)

    # Estimated VMEM use: double-buffered logits + lane-padded targets blocks,
    # double-buffered (8,128) output block, (1,1) scalar scratch, plus slack.
    est = (2 * tile_n * C * itemsize
           + 2 * tile_n * 128 * 4
           + 2 * 8 * 128 * 4
           + 8 * 128 * 4
           + 2 * 2**20)
    vmem_limit = int(min(vmem_cap - 4 * 2**20, max(32 * 2**20, est)))

    out = pl.pallas_call(
        kernel,
        out_shape=jax.ShapeDtypeStruct((n_split * 8, 128), jnp.float32),
        grid_spec=pltpu.PrefetchScalarGridSpec(
            num_scalar_prefetch=0,
            grid=(n_split, steps_per_core),
            in_specs=[
                pl.BlockSpec((tile_n, C), lambda c, i: (c * steps_per_core + i, 0)),
                pl.BlockSpec((tile_n, 1), lambda c, i: (c * steps_per_core + i, 0)),
            ],
            out_specs=pl.BlockSpec((8, 128), lambda c, i: (c, 0)),
            scratch_shapes=[pltpu.VMEM((1, 1), jnp.float32)],
        ),
        compiler_params=pltpu.CompilerParams(
            dimension_semantics=("parallel", "arbitrary"),
            vmem_limit_bytes=vmem_limit,
        ),
    )(logits_p, targets2d)

    # Each core wrote its partial sum at (0, 0) of its (8, 128) block; the rest
    # is zero, so a plain sum combines the per-core partials.
    return jnp.sum(out) / N


def _reference_focal_loss(logits, targets, gamma=GAMMA):
    logp = jax.nn.log_softmax(logits.astype(jnp.float32), axis=-1)
    ce = -jnp.take_along_axis(logp, targets[:, None].astype(jnp.int32), axis=-1)[:, 0]
    pt = jnp.exp(-ce)
    return jnp.mean((1.0 - pt) ** gamma * ce)


if __name__ == "__main__":
    key = jax.random.PRNGKey(0)
    k_logits, k_targets = jax.random.split(key)

    N, C = 16, 32  # small classification problem: 16 samples, 32 classes
    logits = jax.random.normal(k_logits, (N, C), dtype=jnp.float32)
    targets = jax.random.randint(k_targets, (N,), 0, C, dtype=jnp.int32)

    loss = focal_loss(logits, targets)
    loss = jax.block_until_ready(loss)

    ref = jax.block_until_ready(_reference_focal_loss(logits, targets))
    assert jnp.allclose(loss, ref, rtol=1e-5, atol=1e-6), (loss, ref)

    print("KERNEL_OK")
</pallas_src>

<mosaic_0001>
module attributes {stable_mosaic.version = 11 : i64} {
  func.func @_focal_loss_kernel(%arg0: i32, %arg1: i32, %arg2: memref<16x32xf32, #tpu.memory_space<vmem>>, %arg3: memref<16x1xi32, #tpu.memory_space<vmem>>, %arg4: memref<8x128xf32, #tpu.memory_space<vmem>>, %arg5: memref<1x1xf32, #tpu.memory_space<vmem>>) attributes {dimension_semantics = [#tpu.dimension_semantics<parallel>, #tpu.dimension_semantics<arbitrary>], iteration_bounds = array<i64: 2, 1>, scalar_prefetch = 0 : i64, scratch_operands = 1 : i64, tpu.core_type = #tpu.core_type<tc>, window_params = [{transform_indices = @transform_0, window_bounds = array<i64: 16, 32>}, {transform_indices = @transform_1, window_bounds = array<i64: 16, 1>}, {transform_indices = @transform_2, window_bounds = array<i64: 8, 128>}]} {
    %c0_i32 = arith.constant 0 : i32
    %0 = arith.cmpi eq, %arg1, %c0_i32 : i32
    %1 = arith.extui %0 : i1 to i32
    %c0_i32_0 = arith.constant 0 : i32
    %2 = arith.cmpi ne, %1, %c0_i32_0 : i32
    scf.if %2 {
      %cst_18 = arith.constant 0.000000e+00 : f32
      %47 = vector.broadcast %cst_18 : f32 to vector<1x1xf32>
      %c0_19 = arith.constant 0 : index
      %c0_20 = arith.constant 0 : index
      %48 = vector.load %arg5[%c0_19, %c0_20] : memref<1x1xf32, #tpu.memory_space<vmem>>, vector<1x1xf32>
      tpu.vector_store %arg5[%c0_19, %c0_20], %47 {strides = array<i32>} : memref<1x1xf32, #tpu.memory_space<vmem>>, vector<1x1xf32>,
    } else {
    }
    %c0 = arith.constant 0 : index
    %c0_1 = arith.constant 0 : index
    %3 = vector.load %arg2[%c0, %c0_1] : memref<16x32xf32, #tpu.memory_space<vmem>>, vector<16x32xf32>
    %c0_2 = arith.constant 0 : index
    %c0_3 = arith.constant 0 : index
    %4 = vector.load %arg3[%c0_2, %c0_3] : memref<16x1xi32, #tpu.memory_space<vmem>>, vector<16x1xi32>
    %cst = arith.constant dense<0xFF800000> : vector<16xf32>
    %5 = vector.multi_reduction <maximumf>, %3, %cst [1] : vector<16x32xf32> to vector<16xf32>
    %6 = vector.shape_cast %5 : vector<16xf32> to vector<16x1xf32>
    %7 = vector.broadcast %6 : vector<16x1xf32> to vector<16x32xf32>
    %8 = arith.subf %3, %7 : vector<16x32xf32>
    %9 = math.exp %8 : vector<16x32xf32>
    %cst_4 = arith.constant dense<0.000000e+00> : vector<16xf32>
    %10 = vector.multi_reduction <add>, %9, %cst_4 [1] : vector<16x32xf32> to vector<16xf32>
    %11 = vector.shape_cast %10 : vector<16xf32> to vector<16x1xf32>
    %12 = math.log %11 : vector<16x1xf32>
    %13 = tpu.iota {dimensions = array<i32: 1>} : vector<1x32xi32>
    %14 = vector.broadcast %13 : vector<1x32xi32> to vector<16x32xi32>
    %15 = vector.broadcast %4 : vector<16x1xi32> to vector<16x32xi32>
    %16 = arith.cmpi eq, %14, %15 : vector<16x32xi32>
    %cst_5 = arith.constant 0.000000e+00 : f32
    %17 = vector.broadcast %cst_5 : f32 to vector<16x32xf32>
    %18 = arith.select %16, %8, %17 : vector<16x32xi1>, vector<16x32xf32>
    %cst_6 = arith.constant dense<0.000000e+00> : vector<16xf32>
    %19 = vector.multi_reduction <add>, %18, %cst_6 [1] : vector<16x32xf32> to vector<16xf32>
    %20 = vector.shape_cast %19 : vector<16xf32> to vector<16x1xf32>
    %21 = arith.subf %20, %12 : vector<16x1xf32>
    %cst_7 = arith.constant 0.000000e+00 : f32
    %22 = vector.broadcast %cst_7 : f32 to vector<16x1xf32>
    %23 = arith.subf %22, %21 : vector<16x1xf32>
    %24 = math.exp %21 : vector<16x1xf32>
    %cst_8 = arith.constant 1.000000e+00 : f32
    %25 = vector.broadcast %cst_8 : f32 to vector<16x1xf32>
    %26 = arith.subf %25, %24 : vector<16x1xf32>
    %27 = arith.mulf %26, %26 : vector<16x1xf32>
    %28 = arith.mulf %27, %23 : vector<16x1xf32>
    %c1_i32 = arith.constant 1 : i32
    %29 = arith.muli %arg0, %c1_i32 : i32
    %30 = arith.addi %29, %arg1 : i32
    %c16_i32 = arith.constant 16 : i32
    %31 = arith.muli %30, %c16_i32 : i32
    %32 = tpu.iota {dimensions = array<i32: 0>} : vector<16x1xi32>
    %33 = vector.broadcast %31 : i32 to vector<16x1xi32>
    %34 = arith.addi %32, %33 : vector<16x1xi32>
    %c16_i32_9 = arith.constant 16 : i32
    %35 = vector.broadcast %c16_i32_9 : i32 to vector<16x1xi32>
    %36 = arith.cmpi slt, %34, %35 : vector<16x1xi32>
    %cst_10 = arith.constant 0.000000e+00 : f32
    %37 = vector.broadcast %cst_10 : f32 to vector<16x1xf32>
    %38 = arith.select %36, %28, %37 : vector<16x1xi1>, vector<16x1xf32>
    %c0_11 = arith.constant 0 : index
    %c0_12 = arith.constant 0 : index
    %39 = vector.load %arg5[%c0_11, %c0_12] : memref<1x1xf32, #tpu.memory_space<vmem>>, vector<1x1xf32>
    %cst_13 = arith.constant dense<0.000000e+00> : vector<1xf32>
    %40 = vector.multi_reduction <add>, %38, %cst_13 [0] : vector<16x1xf32> to vector<1xf32>
    %41 = vector.shape_cast %40 : vector<1xf32> to vector<1x1xf32>
    %42 = arith.addf %39, %41 : vector<1x1xf32>
    %c0_14 = arith.constant 0 : index
    %c0_15 = arith.constant 0 : index
    %43 = vector.load %arg5[%c0_14, %c0_15] : memref<1x1xf32, #tpu.memory_space<vmem>>, vector<1x1xf32>
    tpu.vector_store %arg5[%c0_14, %c0_15], %42 {strides = array<i32>} : memref<1x1xf32, #tpu.memory_space<vmem>>, vector<1x1xf32>,
    %c0_i32_16 = arith.constant 0 : i32
    %44 = arith.cmpi eq, %arg1, %c0_i32_16 : i32
    %45 = arith.extui %44 : i1 to i32
    %c0_i32_17 = arith.constant 0 : i32
    %46 = arith.cmpi ne, %45, %c0_i32_17 : i32
    scf.if %46 {
      %47 = tpu.iota {dimensions = array<i32: 0>} : vector<8x128xi32>
      %48 = tpu.iota {dimensions = array<i32: 1>} : vector<8x128xi32>
      %c0_i32_18 = arith.constant 0 : i32
      %49 = vector.broadcast %c0_i32_18 : i32 to vector<8x128xi32>
      %50 = arith.cmpi eq, %47, %49 : vector<8x128xi32>
      %c0_i32_19 = arith.constant 0 : i32
      %51 = vector.broadcast %c0_i32_19 : i32 to vector<8x128xi32>
      %52 = arith.cmpi eq, %48, %51 : vector<8x128xi32>
      %53 = arith.andi %50, %52 : vector<8x128xi1>
      %c0_20 = arith.constant 0 : index
      %c0_21 = arith.constant 0 : index
      %54 = vector.load %arg5[%c0_20, %c0_21] : memref<1x1xf32, #tpu.memory_space<vmem>>, vector<1x1xf32>
      %cst_22 = arith.constant 0.000000e+00 : f32
      %55 = vector.shape_cast %54 : vector<1x1xf32> to vector<1x1xf32>
      %56 = vector.broadcast %55 : vector<1x1xf32> to vector<8x128xf32>
      %57 = vector.broadcast %cst_22 : f32 to vector<8x128xf32>
      %58 = arith.select %53, %56, %57 : vector<8x128xi1>, vector<8x128xf32>
      %c0_23 = arith.constant 0 : index
      %c0_24 = arith.constant 0 : index
      %59 = vector.load %arg4[%c0_23, %c0_24] : memref<8x128xf32, #tpu.memory_space<vmem>>, vector<8x128xf32>
      tpu.vector_store %arg4[%c0_23, %c0_24], %58 {strides = array<i32>} : memref<8x128xf32, #tpu.memory_space<vmem>>, vector<8x128xf32>,
    } else {
    }
    return
  }
  func.func @transform_0(%arg0: i32, %arg1: i32) -> (i32, i32) {
    %c1_i32 = arith.constant 1 : i32
    %0 = arith.muli %arg0, %c1_i32 : i32
    %1 = arith.addi %0, %arg1 : i32
    %c0_i32 = arith.constant 0 : i32
    %c0_i32_0 = arith.constant 0 : i32
    return %1, %c0_i32 : i32, i32
  }
  func.func @transform_1(%arg0: i32, %arg1: i32) -> (i32, i32) {
    %c1_i32 = arith.constant 1 : i32
    %0 = arith.muli %arg0, %c1_i32 : i32
    %1 = arith.addi %0, %arg1 : i32
    %c0_i32 = arith.constant 0 : i32
    %c0_i32_0 = arith.constant 0 : i32
    return %1, %c0_i32 : i32, i32
  }
  func.func @transform_2(%arg0: i32, %arg1: i32) -> (i32, i32) {
    %c0_i32 = arith.constant 0 : i32
    %c0_i32_0 = arith.constant 0 : i32
    return %arg0, %c0_i32 : i32, i32
  }
}

</mosaic_0001>

<bundles_post_ra>
// kernel: tpu_custom_call.1
= control target key start
LH: loop header
LB: loop body
LE: loop exit
PB: predicated region body
PF: predicated region fallthrough
CT: control target
= control target key end

     0   :  { %7 = vsyncpa [#allocation4], 0  ;;  %s695_s0 = inlined_call_operand.vmem [shape: f32[32,32], index: 0, kind: input, shape index: {}]   ;;  %s696_s1 = inlined_call_operand.vmem [shape: s32[32,1], index: 1, kind: input, shape index: {}]   ;;  %s697_s2 = inlined_call_operand.hbm [shape: f32[16,128], index: 2, kind: output, shape index: {}]  }
   0x1   :  { %9 = vsyncpa [#allocation4 + $0x1], 0  ;;  %s574_s9 = smov 0   ;;  %s576_s10 = smov 0  }
   0x2   :  { %s578_s11 = smov 0   ;;  %s580_s12 = smov 0  }
   0x3   :  { %s582_s13 = smov 0   ;;  %s584_s14 = smov 0  }
   0x4 LB: > { %s391_s15 = sadd.s32 4294967295, %s554_s14   ;;  %s392_s16 = sadd.s32 4294967294, %s554_s14   ;;  %s554_s14 = sphi %s584_s14, %s15_s14   ;;  %s550_s13 = sphi %s582_s13, %s704_s13   ;;  %s546_s12 = sphi %s580_s12, %s703_s12   ;;  %s542_s11 = sphi %s578_s11, %s702_s11   ;;  %s538_s10 = sphi %s576_s10, %s701_s10   ;;  %s534_s9 = sphi %s574_s9, %s700_s9  }
   0x5   : > { %s27_s17 = sadd.s32 1, %s550_s13  ;;  %s90_s18 = sadd.s32 1, %s542_s11 }
   0x6   : > { %p29_p0 = scmp.ge.s32.totalorder %s27_s17, 2  ;;  %p100_p1 = scmp.ne.s32.totalorder %s542_s11, %s538_s10 }
   0x7   : > { %p101_p2 = scmp.eq.s32.totalorder %s391_s15, 1  ;;  %p106_p3 = scmp.ne.s32.totalorder %s538_s10, %s534_s9 }
   0x8   : > { %s706_s17 = smov (%p29_p0, %s27_s17), 0  ;;  %p107_p5 = scmp.eq.s32.totalorder %s392_s16, 1 }
   0x9   : > { %p614_p4 = por %p101_p2, %p100_p1  ;;  %s87_s20 = ssub.s32 %s550_s13, %s706_s17 }
   0xa   : > { %p395_p6 = scmp.ge.s32.totalorder %s554_s14, 1  ;;  %p88_p7 = scmp.eq.s32.totalorder %s87_s20, 0 }
   0xb   : > { %p621_p8 = por %p107_p5, %p106_p3  ;;  %p147_p9 = scmp.lt.s32.totalorder %s554_s14, 3 }
   0xc   : > { %s627_s22 = scalar_select %p88_p7, %s542_s11, %s90_s18  }
   0xd   : > { %p148_p10 = pnand %p395_p6, %p147_p9 }
   0xe   : > { %s397_s23 = sshll.u32 (!%p148_p10), %s546_s12, 1  ;;  %s401_s3 = sshll.u32 (!%p148_p10), %s546_s12, 4 }
   0xf   : > { %151 = sbr.rel (%p148_p10) target bundleno = 527 (0x20f), region = 28  ;;  %p178_p11 = scmp.lt.s32.totalorder (!%p148_p10), %s397_s23, 3 }
  0x10   : > { %s173_s4 = sand.u32 (!%p148_p10), 1, %s538_s10   ;;  %s404_s8 = sshll.u32 (!%p148_p10), %s546_s12, 7 }
  0x11   : > { %s396_s5 = sshll.u32 (!%p148_p10), %s173_s4, 3  ;;  %s655_s18 = scalar_lea.hbm (!%p148_p10), %s697_s2, %s404_s8 }
  0x12   : > { %s175_s6 = scalar_lea.vmem (!%p148_p10), [#allocation3], %s396_s5  ;;  %s299_s20 = scalar_lea.sflag (!%p148_p10), [#allocation4], %s173_s4 }
  0x13   : > { %s312_s7 = sshll.u32 (!%p148_p10), %s175_s6, 4  ;;  %s313_s7 = int_to_ptr.vmem [resolvable:$true] %s312_s7 }
  0x14   : > { %v556_v0 = vmov 0   ;;  %s708_s23 = smov (!%p178_p11, %s397_s23), 3  ;;  %vm202_vm0 = vcmask 261120   ;;  %v225_v13 = vlaneseq  ;;  %vm196_vm3 = vcmask 0  }
  0x15   : > { %464 = vset.pattern.permute.xlu1 %v556_v0  ;;  %465 = vset.pattern.permute.xlu0 %v556_v0  ;;  %s398_s24 = sshll.u32 %s708_s23, 3  ;;  %v557_v25 = vmov 0.0   ;;  %v262_v41 = vstv %s401_s3  ;;  %s478_s23 = scalar_lea.vmem %s313_s7, 128 }
  0x16   : > { %s181_s27 = scalar_lea.vmem %s695_s0, %s398_s24  ;;  %s189_s30 = scalar_lea.vmem %s696_s1, %s398_s24  ;;  %v638_v15 = vand.u32 127, %v225_v13  ;;  %197 = vst.msk [vmem:[#allocation2] sm:$0x1] %vm196_vm3, %v557_v25  ;;  %v260_v38 = vshrl.u32 %v225_v13, 7 }
  0x17   : > { %v198_v1 = vld [vmem:[%s181_s27] sm:$0xff]  ;;  %v199_v2 = vld [vmem:[%s181_s27 + $0x8] sm:$0xff]  ;;  %p479_p12 = scmp.ne.s32.totalorder %s313_s7, %s478_s23  ;;  %s558_s24 = smov [#allocation3]  }
  0x18   : > { %v200_v3 = vld [vmem:[%s189_s30] sm:$0xff]  ;;  %v203_v4 = vsel %vm202_vm0, %v198_v1, -inf  ;;  %v201_v5 = vld [vmem:[%s189_s30 + $0x8] sm:$0xff]  ;;  %v206_v6 = vsel %vm202_vm0, %v199_v2, -inf  ;;  %v261_v40 = vadd.s32 8, %v260_v38  ;;  %v263_v45 = vadd.s32 %v262_v41, %v260_v38  ;;  %s482_s25 = sshll.u32 %s558_s24, 4  ;;  %s483_s25 = int_to_ptr.vmem [resolvable:$false] %s482_s25 }
  0x19   : > { %228 = vperm.xlu1 %464, %v200_v3   ;;  %204 = vmax.xlane.f32.xlu0 %v203_v4  ;;  %vm283_vm6 = vcmp.eq.s32.totalorder %v260_v38, 0  ;;  %vm284_vm7 = vcmp.eq.s32.totalorder %v638_v15, 0  ;;  %p480_p13 = pnand %p479_p12, %p614_p4  ;;  %s484_s12 = scalar_lea.vmem %s483_s25, 256 }
  0x1a   : > { %v264_v46 = vadd.s32 %v262_v41, %v261_v40  ;;  %vm265_vm4 = vcmp.lt.s32.totalorder %v263_v45, 16  ;;  %vm285_vm8 = vmand %vm283_vm6, %vm284_vm7  ;;  %p485_p1 = scmp.lt.s32.totalorder %s313_s7, %s483_s25  ;;  %p486_p2 = scmp.lt.s32.totalorder %s484_s12, %s478_s23 }
  0x1b   : > { %p481_p0 = pneg %p480_p13 }
  0x1c   : > { %vm266_vm5 = vcmp.lt.s32.totalorder %v264_v46, 16  ;;  %p487_p3 = por %p486_p2, %p485_p1 }
  0x1d   : > { %231 = vperm.xlu1 %464, %v201_v5   ;;  %207 = vmax.xlane.f32.xlu0 %v206_v6  ;;  %v269_v61 = vld [vmem:[#allocation2] sm:$0x1] }
  0x1e   : > { %p488_p5 = pnand %p487_p3, %p481_p0 }
  0x94   : > { %v229_v14 = vpop.permute.xlu1 %228 }
  0x95   : > { %vm233_vm1 = vcmp.eq.s32.totalorder %v638_v15, %v229_v14 }
  0x98   : > { %v232_v17 = vpop.permute.xlu1 %231 }
  0x99   : > { %vm234_vm2 = vcmp.eq.s32.totalorder %v638_v15, %v232_v17 }
  0xa2   : > { %v205_v7 = vpop.xlane.xlu0 %204 }
  0xa3   : > { %v209_v8 = vsub.f32 %v198_v1, %v205_v7 }
  0xa5   : > { %v211_v9 = vmul.f32 1.442695, %v209_v8  ;;  %v235_v19 = vsel %vm233_vm1, %v209_v8, 0.0 }
  0xa6   : > { %v208_v10 = vpop.xlane.xlu0 %207  ;;  %v237_v21 = vsel %vm202_vm0, %v235_v19, 0.0 }
  0xa7   : > { %466 = vpow2.f32 %v211_v9  ;;  %v210_v11 = vsub.f32 %v199_v2, %v208_v10 }
  0xa9   : > { %v213_v12 = vmul.f32 1.442695, %v210_v11  ;;  %v236_v23 = vsel %vm234_vm2, %v210_v11, 0.0 }
  0xaa   : > { %v240_v24 = vsel %vm202_vm0, %v236_v23, 0.0 }
  0xab   : > { %468 = vpow2.f32 %v213_v12 }
  0xb4   : > { %v467_v16 = vpop.eup %466 }
  0xb5   : > { %v215_v18 = vsel %vm202_vm0, %v467_v16, 0.0 }
  0xb6   : > { %216 = vadd.xlane.f32.xlu0 %v215_v18 }
  0xb8   : > { %v469_v20 = vpop.eup %468 }
  0xb9   : > { %v218_v22 = vsel %vm202_vm0, %v469_v20, 0.0 }
  0xba   : > { %238 = vadd.xlane.f32.xlu0 %v237_v21  ;;  %219 = vadd.xlane.f32.xlu1 %v218_v22 }
  0xbe   : > { %241 = vadd.xlane.f32.xlu0 %v240_v24 }
 0x13f   : > { %v217_v26 = vpop.xlane.xlu0 %216 }
 0x140   : > { %470 = vlog2.f32 %v217_v26 }
 0x143   : > { %v220_v27 = vpop.xlane.xlu1 %219  ;;  %v239_v29 = vpop.xlane.xlu0 %238 }
 0x144   : > { %472 = vlog2.f32 %v220_v27 }
 0x147   : > { %v242_v35 = vpop.xlane.xlu0 %241 }
 0x14d   : > { %v471_v28 = vpop.eup %470 }
 0x14e   : > { %v222_v30 = vmul.f32 0.6931472, %v471_v28 }
 0x150   : > { %v243_v31 = vsub.f32 %v239_v29, %v222_v30 }
 0x151   : > { %v473_v32 = vpop.eup %472 }
 0x152   : > { %v247_v33 = vmul.f32 1.442695, %v243_v31  ;;  %v224_v34 = vmul.f32 0.6931472, %v473_v32  ;;  %v245_v47 = vsub.f32 0.0, %v243_v31 }
 0x154   : > { %474 = vpow2.f32 %v247_v33  ;;  %v244_v36 = vsub.f32 %v242_v35, %v224_v34 }
 0x156   : > { %v249_v37 = vmul.f32 1.442695, %v244_v36  ;;  %v246_v50 = vsub.f32 0.0, %v244_v36 }
 0x158   : > { %476 = vpow2.f32 %v249_v37 }
 0x161   : > { %v475_v39 = vpop.eup %474 }
 0x162   : > { %v251_v42 = vsub.f32 1.0, %v475_v39 }
 0x164   : > { %v253_v43 = vmul.f32 %v251_v42, %v251_v42 }
 0x165   : > { %v477_v44 = vpop.eup %476 }
 0x166   : > { %v252_v48 = vsub.f32 1.0, %v477_v44  ;;  %v255_v49 = vmul.f32 %v253_v43, %v245_v47 }
 0x168   : > { %v254_v51 = vmul.f32 %v252_v48, %v252_v48  ;;  %v267_v53 = vsel %vm265_vm4, %v255_v49, 0.0 }
 0x16a   : > { %v256_v52 = vmul.f32 %v254_v51, %v246_v50 }
 0x16c   : > { %v268_v54 = vsel %vm266_vm5, %v256_v52, 0.0 }
 0x16d   : > { %v270_v55 = vadd.f32 %v268_v54, %v267_v53 }
 0x16f   : > { %v271_v56 = vrot.slane %v270_v55, 4 }
 0x171   : > { %v272_v57 = vadd.f32 %v271_v56, %v270_v55 }
 0x173   : > { %v273_v58 = vrot.slane %v272_v57, 2 }
 0x175   : > { %v274_v59 = vadd.f32 %v273_v58, %v272_v57 }
 0x177   : > { %v275_v60 = vrot.slane %v274_v59, 1 }
 0x179   : > { %v276_v62 = vadd.f32 %v275_v60, %v274_v59 }
 0x17b   : > { %v277_v63 = vadd.f32 %v276_v62, %v269_v61 }
 0x17d   : > { %279 = vst.msk [vmem:[#allocation2] sm:$0x1] %vm196_vm3, %v277_v63 }
 0x184   : > { %v402_v0 = vld [vmem:[#allocation2] ss:$0 sm:$0xff] }
 0x185   : > { %293 = vperm.xlu0 %465, %v402_v0  }
 0x200   : > { %v294_v1 = vpop.permute.xlu0 %293 }
 0x201   : > { %v296_v2 = vsel %vm285_vm8, %v294_v1, 0.0 }
 0x202   : > { %297 = vst [vmem:[%s175_s6] sm:$0xff] %v296_v2 }
 0x203   : > { %491 = shalt.err (!%p488_p5)
}
 0x204   : > { %s492_s26 = scalar_lea.hbm %s655_s18, 128  ;;  %s496_s29 = scalar_lea.hbm %s697_s2, 256 }
 0x205   : > { %p493_p6 = scmp.ne.s32.totalorder %s655_s18, %s492_s26  ;;  %p497_p10 = scmp.lt.s32.totalorder %s655_s18, %s697_s2 }
 0x206   : > { %p498_p11 = scmp.lt.s32.totalorder %s496_s29, %s492_s26 }
 0x207   : > { %p494_p7 = pnand %p493_p6, %p614_p4 }
 0x208   : > { %p499_p12 = por %p498_p11, %p497_p10 }
 0x209   : > { %p495_p9 = pneg %p494_p7 }
 0x20b   : > { %p500_p13 = pnand %p499_p12, %p495_p9 }
 0x20d   : > { %503 = shalt.err (!%p500_p13)
}
 0x20e   : > { %407 = dma.vmem_to_hbm [thread:$0]  (%p614_p4), %s313_s7, 128, %s655_s18, %s299_s20  }
 0x20f PF: > { %p413_p0 = scmp.ge.s32.totalorder %s554_s14, 2  ;;  %s324_s4 = sand.u32 1, %s534_s9  }
 0x210   : > { %s325_s5 = scalar_lea.sflag [#allocation4], %s324_s4 }
 0x211   : > { %p410_p1 = pnand %p413_p0, %p621_p8 }
 0x213   : > { %p411_p2 = pneg %p410_p1 }
 0x215   : > { %529 = dma.done.wait (%p411_p2), %s325_s5, 128  }
 0x216   : > { %531 = vsyncadd (%p411_p2), %s325_s5, 4294967168  ;;  %s15_s14 = sadd.s32 1, %s554_s14   ;;  %s700_s9 = smov %s538_s10 }
 0x217   : > { %p12_p3 = scmp.ge.s32.totalorder %s15_s14, 4   ;;  %s701_s10 = smov %s542_s11 }
 0x218   : > { %s702_s11 = smov %s627_s22  ;;  %s703_s12 = smov %s550_s13 }
 0x219   : > { %s704_s13 = smov %s706_s17  ;;  %14 = sbr.rel (!%p12_p3) target bundleno = 4 (0x4), region = 74 }
 0x21e   :  { %330 = vsyncpa [#allocation4], 1 }
 0x21f   :  { %332 = vsyncpa [#allocation4 + $0x1], 1 }

</bundles_post_ra>
